<compile_context>
chip_gen: v5e
topology: v5e:2x2
jax: 0.10.0
libtpu: 0.0.40
codegen_flags: <defaults>
</compile_context>

<pallas_src>
import functools

import jax
import jax.numpy as jnp
from jax import lax
from jax.experimental import pallas as pl
from jax.experimental.pallas import tpu as pltpu  # noqa: F401  (kept for convention)


def _primary_caps_kernel(patch_ref, w_ref, b_ref, o_ref, *,
                         h_out, w_out, hw_pad, seg_per_b):
    # patch_ref: (KKC, LANES)   im2col columns, batch folded into lanes
    #                           lane l = b*hw_pad + (h*w_out + w); padded lanes are 0
    # w_ref:     (C_out, KKC)   conv weight flattened as (C_out, C_in*K*K)
    # b_ref:     (C_out, 1)     conv bias
    # o_ref:     (C_out, LANES) squashed conv output (padded lanes -> 0)
    conv = jnp.dot(w_ref[...], patch_ref[...],
                   preferred_element_type=jnp.float32,
                   precision=jax.lax.Precision.HIGHEST)
    conv = conv + b_ref[...]

    lanes = conv.shape[-1]
    nseg = (lanes // hw_pad) * seg_per_b          # one segment per (batch, h_out) row
    hw_shift = hw_pad.bit_length() - 1            # log2(hw_pad), hw_pad is a power of 2
    sg_shift = seg_per_b.bit_length() - 1         # log2(seg_per_b)

    def segment_matrix(shape, lane_dim, seg_dim):
        # 0/1 membership: lane l belongs to segment s iff they share the same batch
        # and l's within-batch position falls inside row (s % seg_per_b) of the
        # valid H_out x W_out window.  Shifts/masks only (no vector integer div).
        l = lax.broadcasted_iota(jnp.int32, shape, lane_dim)
        s = lax.broadcasted_iota(jnp.int32, shape, seg_dim)
        b_l = l >> hw_shift
        p_l = l & (hw_pad - 1)
        b_s = s >> sg_shift
        r_s = s & (seg_per_b - 1)
        start = r_s * w_out
        m = (b_l == b_s) & (r_s < h_out) & (p_l >= start) & (p_l < start + w_out)
        return jnp.where(m, jnp.float32(1.0), jnp.float32(0.0)).astype(jnp.float32)

    seg = segment_matrix((lanes, nseg), 0, 1)     # (LANES, NSEG)
    seg_t = segment_matrix((nseg, lanes), 1, 0)   # (NSEG, LANES)

    # Per-(c_out, b, h_out) sum of squares over the W_out lanes, as an MXU matmul
    # against the 0/1 segment matrix (keeps the reduction lane-dense, off the XLU).
    norm_sq = jnp.dot(conv * conv, seg,
                      preferred_element_type=jnp.float32,
                      precision=jax.lax.Precision.HIGHEST)    # (C_out, NSEG)
    norm = jnp.sqrt(norm_sq)

    # squash: scale * (x / norm) == x * norm / ((1 + norm) * (1 + norm^2)).
    # (Also finite at norm == 0: factor -> 0 instead of 0/0.)
    factor = norm / ((1.0 + norm) * (1.0 + norm_sq))          # (C_out, NSEG)

    # Broadcast each (c_out, b, h_out) factor back over its W_out lanes.
    factor_hw = jnp.dot(factor, seg_t,
                        preferred_element_type=jnp.float32,
                        precision=jax.lax.Precision.HIGHEST)  # (C_out, LANES)
    o_ref[...] = (conv * factor_hw).astype(o_ref.dtype)


@functools.partial(jax.jit, static_argnames=("output_dim", "stride"))
def primary_caps_forward(x, weight, bias, *, output_dim, stride):
    B, C_in, H, W = x.shape
    C_out, _, K, _ = weight.shape
    H_out = (H - K) // stride + 1
    W_out = (W - K) // stride + 1
    KKC = C_in * K * K
    HW = H_out * W_out
    # Per-batch lane padding to a power of two -> lane-dense (C_out, B*HW_PAD) slab.
    HW_PAD = max(8, 1 << (HW - 1).bit_length())
    SEG_PER_B = max(1, 1 << (H_out - 1).bit_length())
    LANES = B * HW_PAD

    # ---- glue (co-jitted with the kernel): im2col, emitted directly lane-dense ----
    # patches[b, (c,kh,kw), (h,w)] = x[b, c, h*stride+kh, w*stride+kw]
    hs = jnp.arange(H_out) * stride
    ws = jnp.arange(W_out) * stride
    kk = jnp.arange(K)
    p = x[:, :, hs[:, None] + kk[None, :], :]             # (B, C, H_out, kh, W)
    p = p[:, :, :, :, ws[:, None] + kk[None, :]]          # (B, C, H_out, kh, W_out, kw)
    patches = jnp.transpose(p, (0, 1, 3, 5, 2, 4)).reshape(B, KKC, HW)
    patches = jnp.pad(patches, ((0, 0), (0, 0), (0, HW_PAD - HW)))   # zero pad lanes
    patches = jnp.transpose(patches, (1, 0, 2)).reshape(KKC, LANES)  # (KKC, B*HW_PAD)

    w_mat = weight.reshape(C_out, KKC)                    # matches (c, kh, kw) order
    b_col = bias.reshape(C_out, 1)

    kernel = functools.partial(_primary_caps_kernel, h_out=H_out, w_out=W_out,
                               hw_pad=HW_PAD, seg_per_b=SEG_PER_B)

    # Single invocation, no grid: whole (tiny) operands live in VMEM, one DMA each,
    # one (C_out, KKC) x (KKC, LANES) matmul, lane-dense (C_out, LANES) output store.
    out = pl.pallas_call(
        kernel,
        out_shape=jax.ShapeDtypeStruct((C_out, LANES), x.dtype),
    )(patches, w_mat, b_col)

    # Drop lane padding and restore NCHW flatten order -> free capsule view.
    out = out.reshape(C_out, B, HW_PAD)[:, :, :HW]        # (C_out, B, HW)
    out = jnp.transpose(out, (1, 0, 2))                   # (B, C_out, HW)  == NCHW flat
    return out.reshape(B, -1, output_dim)


def _reference(x, weight, bias, output_dim, stride):
    conv = lax.conv_general_dilated(
        x, weight, window_strides=(stride, stride), padding="VALID",
        dimension_numbers=("NCHW", "OIHW", "NCHW"),
        precision=lax.Precision.HIGHEST)
    conv = conv + bias.reshape(1, -1, 1, 1)
    norm = jnp.sqrt(jnp.sum(conv * conv, axis=-1, keepdims=True))
    norm_sq = norm ** 2
    scale = (norm_sq / (1.0 + norm)) / (1.0 + norm_sq)
    sq = scale * (conv / norm)
    return sq.reshape(x.shape[0], -1, output_dim)


if __name__ == "__main__":
    # Small-shape instantiation of PrimaryCapsLayer(output_dim=4, num_capsules=4,
    # in_channels=8, kernel_size=3, stride=2)
    output_dim, num_capsules, in_channels, kernel_size, stride = 4, 4, 8, 3, 2
    C_out = output_dim * num_capsules
    B, H, W = 2, 16, 16

    key = jax.random.PRNGKey(0)
    k1, k2, k3 = jax.random.split(key, 3)
    x = jax.random.normal(k1, (B, in_channels, H, W), dtype=jnp.float32)

    # Deterministic Conv2d-style init (uniform in +/- 1/sqrt(fan_in))
    fan_in = in_channels * kernel_size * kernel_size
    bound = 1.0 / (fan_in ** 0.5)
    weight = jax.random.uniform(
        k2, (C_out, in_channels, kernel_size, kernel_size),
        minval=-bound, maxval=bound, dtype=jnp.float32)
    bias = jax.random.uniform(
        k3, (C_out,), minval=-bound, maxval=bound, dtype=jnp.float32)

    out = primary_caps_forward(x, weight, bias, output_dim=output_dim, stride=stride)
    out = jax.block_until_ready(out)

    ref = _reference(x, weight, bias, output_dim, stride)
    assert out.shape == ref.shape, (out.shape, ref.shape)
    # Exact divide (no approx reciprocal) + HIGHEST-precision matmuls -> tight tolerance.
    assert jnp.allclose(out, ref, atol=1e-5, rtol=1e-5), float(
        jnp.max(jnp.abs(out - ref)))
    print("KERNEL_OK")
</pallas_src>

<mosaic_0001>
module attributes {stable_mosaic.version = 11 : i64} {
  func.func @_primary_caps_kernel(%arg0: memref<72x128xf32, #tpu.memory_space<vmem>>, %arg1: memref<16x72xf32, #tpu.memory_space<vmem>>, %arg2: memref<16x1xf32, #tpu.memory_space<vmem>>, %arg3: memref<16x128xf32, #tpu.memory_space<vmem>>) attributes {dimension_semantics = [], scalar_prefetch = 0 : i64, scratch_operands = 0 : i64, tpu.core_type = #tpu.core_type<tc>} {
    %c0 = arith.constant 0 : index
    %c0_0 = arith.constant 0 : index
    %0 = vector.load %arg1[%c0, %c0_0] : memref<16x72xf32, #tpu.memory_space<vmem>>, vector<16x72xf32>
    %c0_1 = arith.constant 0 : index
    %c0_2 = arith.constant 0 : index
    %1 = vector.load %arg0[%c0_1, %c0_2] : memref<72x128xf32, #tpu.memory_space<vmem>>, vector<72x128xf32>
    %cst = arith.constant dense<0.000000e+00> : vector<16x128xf32>
    %2 = tpu.matmul %0, %1, %cst {dimension_numbers = #tpu.dot_dimension_numbers<[1], [0], [0], [1], [0, 0, 1, 1], [], []>, precision = #tpu.contract_precision<fp32>} : vector<16x72xf32>, vector<72x128xf32>, vector<16x128xf32> -> vector<16x128xf32>
    %c0_3 = arith.constant 0 : index
    %c0_4 = arith.constant 0 : index
    %3 = vector.load %arg2[%c0_3, %c0_4] : memref<16x1xf32, #tpu.memory_space<vmem>>, vector<16x1xf32>
    %4 = vector.broadcast %3 : vector<16x1xf32> to vector<16x128xf32>
    %5 = arith.addf %2, %4 : vector<16x128xf32>
    %6 = tpu.iota {dimensions = array<i32: 0>} : vector<128x16xi32>
    %7 = tpu.iota {dimensions = array<i32: 1>} : vector<128x16xi32>
    %c6_i32 = arith.constant 6 : i32
    %8 = vector.broadcast %c6_i32 : i32 to vector<128x16xi32>
    %9 = arith.shrsi %6, %8 : vector<128x16xi32>
    %c63_i32 = arith.constant 63 : i32
    %10 = vector.broadcast %c63_i32 : i32 to vector<128x16xi32>
    %11 = arith.andi %6, %10 : vector<128x16xi32>
    %c3_i32 = arith.constant 3 : i32
    %12 = vector.broadcast %c3_i32 : i32 to vector<128x16xi32>
    %13 = arith.shrsi %7, %12 : vector<128x16xi32>
    %c7_i32 = arith.constant 7 : i32
    %14 = vector.broadcast %c7_i32 : i32 to vector<128x16xi32>
    %15 = arith.andi %7, %14 : vector<128x16xi32>
    %c7_i32_5 = arith.constant 7 : i32
    %16 = vector.broadcast %c7_i32_5 : i32 to vector<128x16xi32>
    %17 = arith.muli %15, %16 : vector<128x16xi32>
    %18 = arith.cmpi eq, %9, %13 : vector<128x16xi32>
    %c7_i32_6 = arith.constant 7 : i32
    %19 = vector.broadcast %c7_i32_6 : i32 to vector<128x16xi32>
    %20 = arith.cmpi slt, %15, %19 : vector<128x16xi32>
    %21 = arith.andi %18, %20 : vector<128x16xi1>
    %22 = arith.cmpi sge, %11, %17 : vector<128x16xi32>
    %23 = arith.andi %21, %22 : vector<128x16xi1>
    %c7_i32_7 = arith.constant 7 : i32
    %24 = vector.broadcast %c7_i32_7 : i32 to vector<128x16xi32>
    %25 = arith.addi %17, %24 : vector<128x16xi32>
    %26 = arith.cmpi slt, %11, %25 : vector<128x16xi32>
    %27 = arith.andi %23, %26 : vector<128x16xi1>
    %cst_8 = arith.constant 1.000000e+00 : f32
    %cst_9 = arith.constant 0.000000e+00 : f32
    %28 = vector.broadcast %cst_8 : f32 to vector<128x16xf32>
    %29 = vector.broadcast %cst_9 : f32 to vector<128x16xf32>
    %30 = arith.select %27, %28, %29 : vector<128x16xi1>, vector<128x16xf32>
    %31 = tpu.iota {dimensions = array<i32: 1>} : vector<16x128xi32>
    %32 = tpu.iota {dimensions = array<i32: 0>} : vector<16x128xi32>
    %c6_i32_10 = arith.constant 6 : i32
    %33 = vector.broadcast %c6_i32_10 : i32 to vector<16x128xi32>
    %34 = arith.shrsi %31, %33 : vector<16x128xi32>
    %c63_i32_11 = arith.constant 63 : i32
    %35 = vector.broadcast %c63_i32_11 : i32 to vector<16x128xi32>
    %36 = arith.andi %31, %35 : vector<16x128xi32>
    %c3_i32_12 = arith.constant 3 : i32
    %37 = vector.broadcast %c3_i32_12 : i32 to vector<16x128xi32>
    %38 = arith.shrsi %32, %37 : vector<16x128xi32>
    %c7_i32_13 = arith.constant 7 : i32
    %39 = vector.broadcast %c7_i32_13 : i32 to vector<16x128xi32>
    %40 = arith.andi %32, %39 : vector<16x128xi32>
    %c7_i32_14 = arith.constant 7 : i32
    %41 = vector.broadcast %c7_i32_14 : i32 to vector<16x128xi32>
    %42 = arith.muli %40, %41 : vector<16x128xi32>
    %43 = arith.cmpi eq, %34, %38 : vector<16x128xi32>
    %c7_i32_15 = arith.constant 7 : i32
    %44 = vector.broadcast %c7_i32_15 : i32 to vector<16x128xi32>
    %45 = arith.cmpi slt, %40, %44 : vector<16x128xi32>
    %46 = arith.andi %43, %45 : vector<16x128xi1>
    %47 = arith.cmpi sge, %36, %42 : vector<16x128xi32>
    %48 = arith.andi %46, %47 : vector<16x128xi1>
    %c7_i32_16 = arith.constant 7 : i32
    %49 = vector.broadcast %c7_i32_16 : i32 to vector<16x128xi32>
    %50 = arith.addi %42, %49 : vector<16x128xi32>
    %51 = arith.cmpi slt, %36, %50 : vector<16x128xi32>
    %52 = arith.andi %48, %51 : vector<16x128xi1>
    %cst_17 = arith.constant 1.000000e+00 : f32
    %cst_18 = arith.constant 0.000000e+00 : f32
    %53 = vector.broadcast %cst_17 : f32 to vector<16x128xf32>
    %54 = vector.broadcast %cst_18 : f32 to vector<16x128xf32>
    %55 = arith.select %52, %53, %54 : vector<16x128xi1>, vector<16x128xf32>
    %56 = arith.mulf %5, %5 : vector<16x128xf32>
    %cst_19 = arith.constant dense<0.000000e+00> : vector<16x16xf32>
    %57 = tpu.matmul %56, %30, %cst_19 {dimension_numbers = #tpu.dot_dimension_numbers<[1], [0], [0], [1], [0, 0, 1, 1], [], []>, precision = #tpu.contract_precision<fp32>} : vector<16x128xf32>, vector<128x16xf32>, vector<16x16xf32> -> vector<16x16xf32>
    %58 = math.sqrt %57 : vector<16x16xf32>
    %cst_20 = arith.constant 1.000000e+00 : f32
    %59 = vector.broadcast %cst_20 : f32 to vector<16x16xf32>
    %60 = arith.addf %59, %58 : vector<16x16xf32>
    %cst_21 = arith.constant 1.000000e+00 : f32
    %61 = vector.broadcast %cst_21 : f32 to vector<16x16xf32>
    %62 = arith.addf %61, %57 : vector<16x16xf32>
    %63 = arith.mulf %60, %62 : vector<16x16xf32>
    %64 = arith.divf %58, %63 : vector<16x16xf32>
    %cst_22 = arith.constant dense<0.000000e+00> : vector<16x128xf32>
    %65 = tpu.matmul %64, %55, %cst_22 {dimension_numbers = #tpu.dot_dimension_numbers<[1], [0], [0], [1], [0, 0, 1, 1], [], []>, precision = #tpu.contract_precision<fp32>} : vector<16x16xf32>, vector<16x128xf32>, vector<16x128xf32> -> vector<16x128xf32>
    %66 = arith.mulf %5, %65 : vector<16x128xf32>
    %c0_23 = arith.constant 0 : index
    %c0_24 = arith.constant 0 : index
    %67 = vector.load %arg3[%c0_23, %c0_24] : memref<16x128xf32, #tpu.memory_space<vmem>>, vector<16x128xf32>
    tpu.vector_store %arg3[%c0_23, %c0_24], %66 {strides = array<i32>} : memref<16x128xf32, #tpu.memory_space<vmem>>, vector<16x128xf32>,
    return
  }
}

</mosaic_0001>

<bundles_post_ra>
// kernel: primary_caps_forward.1
= control target key start
LH: loop header
LB: loop body
LE: loop exit
PB: predicated region body
PF: predicated region fallthrough
CT: control target
= control target key end

     0   :  { %vm37_vm0 = vcmask 588800   ;;  %s2092_s0 = inlined_call_operand.vmem [shape: f32[72,128], index: 0, kind: input, shape index: {}]   ;;  %s2093_s1 = inlined_call_operand.vmem [shape: f32[16,72], index: 1, kind: input, shape index: {}]   ;;  %s2094_s2 = inlined_call_operand.vmem [shape: f32[16,1], index: 2, kind: input, shape index: {}]   ;;  %s2095_s3 = inlined_call_operand.vmem [shape: f32[16,128], index: 3, kind: output, shape index: {}]  }
   0x1   :  { %v24_v0 = vld [vmem:[%s2092_s0 + $0x40] sm:$0xff]  ;;  %v23_v1 = vld [vmem:[%s2092_s0 + $0x38] sm:$0xff]  ;;  %v22_v2 = vld [vmem:[%s2092_s0 + $0x30] sm:$0xff] }
   0x2   :  { %v1148_v3 = vand.u32 4294901760, %v24_v0  ;;  %v1150_v4 = vand.u32 4294901760, %v23_v1  ;;  %v1152_v5 = vand.u32 4294901760, %v22_v2  ;;  %v21_v6 = vld [vmem:[%s2092_s0 + $0x28] sm:$0xff]  ;;  %v20_v7 = vld [vmem:[%s2092_s0 + $0x20] sm:$0xff]  ;;  %v19_v8 = vld [vmem:[%s2092_s0 + $0x18] sm:$0xff] }
   0x3   :  { %v1163_v9 = vand.u32 4294901760, %v21_v6  ;;  %v1165_v10 = vand.u32 4294901760, %v20_v7  ;;  %v1167_v11 = vand.u32 4294901760, %v19_v8  ;;  %v18_v12 = vld [vmem:[%s2092_s0 + $0x10] sm:$0xff]  ;;  %v17_v13 = vld [vmem:[%s2092_s0 + $0x8] sm:$0xff]  ;;  %v16_v14 = vld [vmem:[%s2092_s0] sm:$0xff] }
   0x4   :  { %52 = vmatpush.msra.mxu0 %v1148_v3  ;;  %v1180_v15 = vsub.f32 %v24_v0, %v1148_v3  ;;  %v1183_v16 = vsub.f32 %v23_v1, %v1150_v4  ;;  %209 = vmatpush.msra.mxu3 %v1148_v3  ;;  %v1187_v17 = vsub.f32 %v22_v2, %v1152_v5  ;;  %v1189_v18 = vand.u32 4294901760, %v18_v12  ;;  %v14_v19 = vld [vmem:[%s2093_s1] sm:$0xff]  ;;  %v15_v38 = vld [vmem:[%s2093_s1 + $0x8] sm:$0xff] }
   0x5   :  { %v1195_v20 = vsub.f32 %v21_v6, %v1163_v9  ;;  %v1198_v21 = vsub.f32 %v20_v7, %v1165_v10  ;;  %v1200_v22 = vand.u32 4294901760, %v17_v13  ;;  %v1203_v23 = vsub.f32 %v19_v8, %v1167_v11 }
   0x6   :  { %54 = vmatpush.msra.mxu0 %v1150_v4  ;;  %165 = vmatpush.msra.mxu2 %v1180_v15  ;;  %v95_v24 = vand.u32 4294901760, %v1180_v15  ;;  %v101_v25 = vand.u32 4294901760, %v1183_v16  ;;  %v107_v26 = vand.u32 4294901760, %v1187_v17  ;;  %v1210_v27 = vand.u32 4294901760, %v16_v14 }
   0x7   :  { %211 = vmatpush.msra.mxu3 %v1150_v4  ;;  %v113_v28 = vand.u32 4294901760, %v1195_v20  ;;  %v119_v29 = vand.u32 4294901760, %v1198_v21  ;;  %v1216_v30 = vsub.f32 %v18_v12, %v1189_v18  ;;  %v39_v31 = vsel %vm37_vm0, %v14_v19, 0 }
   0x8   :  { %56 = vmatpush.msra.mxu0 %v1152_v5  ;;  %168 = vmatpush.msra.mxu2 %v1183_v16  ;;  %v96_v32 = vsub.f32 %v1180_v15, %v95_v24  ;;  %v102_v33 = vsub.f32 %v1183_v16, %v101_v25  ;;  %v108_v34 = vsub.f32 %v1187_v17, %v107_v26  ;;  %v1230_v35 = vand.u32 4294901760, %v39_v31 }
   0x9   :  { %213 = vmatpush.msra.mxu3 %v1152_v5  ;;  %v114_v36 = vsub.f32 %v1195_v20, %v113_v28  ;;  %v125_v37 = vand.u32 4294901760, %v1203_v23  ;;  %v1244_v42 = vsub.f32 %v17_v13, %v1200_v22  ;;  %v120_v44 = vsub.f32 %v1198_v21, %v119_v29  ;;  %v25_v13 = vld [vmem:[%s2094_s2] sm:$0xff] }
   0xa   :  { %58 = vmatpush.msra.mxu0 %v1163_v9  ;;  %v97_v39 = vand.u32 4294901760, %v96_v32  ;;  %171 = vmatpush.msra.mxu2 %v1187_v17  ;;  %v103_v40 = vand.u32 4294901760, %v102_v33  ;;  %v70_v41 = vsub.f32 %v39_v31, %v1230_v35  ;;  %v109_v43 = vand.u32 4294901760, %v108_v34 }
   0xb   :  { %215 = vmatpush.msra.mxu3 %v1163_v9  ;;  %v131_v46 = vand.u32 4294901760, %v1216_v30  ;;  %v1253_v47 = vsub.f32 %v16_v14, %v1210_v27  ;;  %v42_v48 = vsel %vm37_vm0, %v15_v38, 0  ;;  %v115_v50 = vand.u32 4294901760, %v114_v36 }
   0xc   :  { %60 = vmatpush.msra.mxu0 %v1165_v10  ;;  %98 = vmatpush.msra.mxu1 %v97_v39  ;;  %v71_v45 = vand.u32 4294901760, %v70_v41  ;;  %v1258_v49 = vand.u32 4294901760, %v42_v48  ;;  %v126_v52 = vsub.f32 %v1203_v23, %v125_v37  ;;  %v137_v53 = vand.u32 4294901760, %v1244_v42 }
   0xd   :  { %174 = vmatpush.msra.mxu2 %v1195_v20  ;;  %217 = vmatpush.msra.mxu3 %v1165_v10  ;;  %v121_v55 = vand.u32 4294901760, %v120_v44  ;;  %v132_v56 = vsub.f32 %v1216_v30, %v131_v46  ;;  %v143_v57 = vand.u32 4294901760, %v1253_v47  ;;  %v325_v2 = vlaneseq }
   0xe   :  { %62 = vmatpush.msra.mxu0 %v1167_v11  ;;  %104 = vmatpush.msra.mxu1 %v103_v40  ;;  %v72_v51 = vsub.f32 %v70_v41, %v71_v45  ;;  %v1268_v54 = vsub.f32 %v42_v48, %v1258_v49  ;;  %v127_v60 = vand.u32 4294901760, %v126_v52  ;;  %v138_v61 = vsub.f32 %v1244_v42, %v137_v53 }
   0xf   :  { %177 = vmatpush.msra.mxu2 %v1198_v21  ;;  %219 = vmatpush.msra.mxu3 %v1167_v11  ;;  %v133_v62 = vand.u32 4294901760, %v132_v56  ;;  %v144_v63 = vsub.f32 %v1253_v47, %v143_v57  ;;  %v1297_v7 = vshrl.u32 %v325_v2, 7  ;;  %v1299_v8 = vand.u32 127, %v325_v2 }
  0x10   :  { %64 = vmatpush.msra.mxu0 %v1189_v18  ;;  %110 = vmatpush.msra.mxu1 %v109_v43  ;;  %v79_v58 = vand.u32 4294901760, %v1268_v54  ;;  %v73_v59 = vand.u32 4294901760, %v72_v51  ;;  %v139_v1 = vand.u32 4294901760, %v138_v61  ;;  %v1116_v17 = vmov 0  }
  0x11   :  { %180 = vmatpush.msra.mxu2 %v1203_v23  ;;  %221 = vmatpush.msra.mxu3 %v1189_v18  ;;  %v145_v6 = vand.u32 4294901760, %v144_v63  ;;  %v341_v14 = vadd.s32 120, %v1297_v7  ;;  %v1309_v15 = vshra.s32 %v1299_v8, 3  ;;  %v377_v16 = vand.u32 7, %v1299_v8 }
  0x12   :  { %66 = vmatpush.msra.mxu0 %v1200_v22  ;;  %116 = vmatpush.msra.mxu1 %v115_v50  ;;  %v80_v0 = vsub.f32 %v1268_v54, %v79_v58  ;;  %v340_v19 = vadd.s32 112, %v1297_v7  ;;  %v338_v33 = vadd.s32 96, %v1297_v7  ;;  %v1118_v43 = vmov 1.0  }
  0x13   :  { %183 = vmatpush.msra.mxu2 %v1216_v30  ;;  %223 = vmatpush.msra.mxu3 %v1200_v22  ;;  %v1316_v31 = vmul.u32 7, %v377_v16  ;;  %vm1318_vm1 = vcmp.lt.s32.totalorder %v377_v16, 7  ;;  %v1117_v30 = vmov 0.0   ;;  %v331_v16 = vadd.s32 40, %v1297_v7 }
  0x14   :  { %68 = vmatpush.msra.mxu0 %v1210_v27  ;;  %122 = vmatpush.msra.mxu1 %v121_v55  ;;  %v81_v12 = vand.u32 4294901760, %v80_v0  ;;  %v358_v20 = vshra.s32 %v340_v19, 6  ;;  %v356_v39 = vshra.s32 %v338_v33, 6  ;;  %v2165_v38 = vmov 0 }
  0x15   :  { %186 = vmatpush.msra.mxu2 %v1244_v42  ;;  %74 = vmatmul.f32.vlgmr.msra.gmra.mxu0 %v73_v59  ;;  %v1330_v34 = vadd.s32 7, %v1316_v31  ;;  %v328_v40 = vadd.s32 16, %v1297_v7 }
  0x16   :  { %249 = vmatpush.msrb.mxu0 %v95_v24  ;;  %128 = vmatpush.msra.mxu1 %v127_v60  ;;  %v339_v24 = vadd.s32 104, %v1297_v7  ;;  %vm1338_vm5 = vcmp.eq.s32.totalorder %v358_v20, %v1309_v15  ;;  %v2161_v20 = vmov 0 }
  0x17   :  { %189 = vmatpush.msra.mxu2 %v1253_v47  ;;  %225 = vmatpush.msra.mxu3 %v1210_v27  ;;  %vm410_vm11 = vmand %vm1338_vm5, %vm1318_vm1 }
  0x18   :  { %253 = vmatpush.msrb.mxu0 %v101_v25  ;;  %134 = vmatpush.msra.mxu1 %v133_v62  ;;  %v359_v25 = vshra.s32 %v341_v14, 6  ;;  %v357_v36 = vshra.s32 %v339_v24, 6  ;;  %v373_v21 = vand.u32 63, %v339_v24  ;;  %v349_v24 = vshra.s32 %v331_v16, 6 }
  0x19   :  { %192 = vmatmul.f32.vlgmr.msra.gmra.mxu2 %v70_v41  ;;  %229 = vmatmul.f32.vlgmr.msra.gmra.mxu3 %v71_v45  ;;  %v372_v41 = vand.u32 63, %v338_v33 }
  0x1a   :  { %257 = vmatpush.msrb.mxu0 %v107_v26  ;;  %140 = vmatpush.msra.mxu1 %v139_v1  ;;  %v375_v26 = vand.u32 63, %v341_v14  ;;  %vm394_vm2 = vcmp.eq.s32.totalorder %v359_v25, %v1309_v15  ;;  %vm1375_vm12 = vcmp.eq.s32.totalorder %v357_v36, %v1309_v15  ;;  %vm1390_vm14 = vcmp.ge.s32.totalorder %v373_v21, %v1316_v31 }
  0x1b   :  { %1107 = vset.pattern.permute.xlu0 %v1116_v17  ;;  %vm411_vm4 = vmand %vm394_vm2, %vm1318_vm1  ;;  %vm1402_vm0 = vcmp.lt.s32.totalorder %v373_v21, %v1330_v34  ;;  %vm1429_vm5 = vcmp.ge.s32.totalorder %v372_v41, %v1316_v31  ;;  %v334_v1 = vadd.s32 64, %v1297_v7 }
  0x1c   :  { %261 = vmatpush.msrb.mxu0 %v113_v28  ;;  %146 = vmatpush.msra.mxu1 %v145_v6  ;;  %v374_v28 = vand.u32 63, %v340_v19  ;;  %vm427_vm3 = vcmp.ge.s32.totalorder %v375_v26, %v1316_v31  ;;  %vm460_vm7 = vcmp.lt.s32.totalorder %v375_v26, %v1330_v34  ;;  %vm409_vm2 = vmand %vm1375_vm12, %vm1318_vm1  ;;  %v332_v6 = vadd.s32 48, %v1297_v7 }
  0x1d   :  { %29 = vperm.xlu0 %1107, %v25_v13   ;;  %82 = vmatmul.f32.gmra.mxu0 %v81_v12  ;;  %vm443_vm6 = vmand %vm411_vm4, %vm427_vm3  ;;  %vm1418_vm3 = vcmp.eq.s32.totalorder %v356_v39, %v1309_v15 }
  0x1e   :  { %265 = vmatpush.msrb.mxu0 %v119_v29  ;;  %299 = vmatpush.msrb.mxu1 %v1148_v3  ;;  %vm1345_vm8 = vcmp.ge.s32.totalorder %v374_v28, %v1316_v31  ;;  %v26_v29 = vld [vmem:[%s2094_s2 + $0x8] sm:$0xff]  ;;  %vm1356_vm9 = vmand %vm443_vm6, %vm460_vm7  ;;  %vm1361_vm10 = vcmp.lt.s32.totalorder %v374_v28, %v1330_v34  ;;  %vm1445_vm7 = vcmp.lt.s32.totalorder %v372_v41, %v1330_v34  ;;  %v352_v28 = vshra.s32 %v334_v1, 6 }
  0x1f   :  { %148 = vmatmul.f32.vlgmr.msra.gmra.mxu1 %v1230_v35  ;;  %1050 = vmatpush.msk.msrb.mxu2 %vm1356_vm9, %v1118_v43  ;;  %vm442_vm13 = vmand %vm410_vm11, %vm1345_vm8  ;;  %v368_v3 = vand.u32 63, %v334_v1  ;;  %v333_v1 = vadd.s32 56, %v1297_v7 }
  0x20   :  { %269 = vmatpush.msrb.mxu0 %v125_v37  ;;  %301 = vmatpush.msrb.mxu1 %v1150_v4  ;;  %v337_v4 = vadd.s32 88, %v1297_v7  ;;  %vm1397_vm15 = vmand %vm442_vm13, %vm1361_vm10 }
  0x21   :  { %197 = vmatmul.f32.gmra.mxu2 %v1268_v54  ;;  %235 = vmatmul.f32.gmra.mxu3 %v79_v58  ;;  %v491_v51 = vsel %vm1397_vm15, 1.0, %v1117_v30  ;;  %vm441_vm4 = vmand %vm409_vm2, %vm1390_vm14  ;;  %v335_v54 = vadd.s32 72, %v1297_v7 }
  0x22   :  { %273 = vmatpush.msrb.mxu0 %v131_v46  ;;  %303 = vmatpush.msrb.mxu1 %v1152_v5  ;;  %v492_v5 = vsel %vm1356_vm9, 1.0, %v1117_v30  ;;  %v336_v46 = vadd.s32 80, %v1297_v7  ;;  %v355_v48 = vshra.s32 %v337_v4, 6  ;;  %v371_v47 = vand.u32 63, %v337_v4  ;;  %vm1440_vm6 = vmand %vm441_vm4, %vm1402_vm0 }
  0x23   :  { %v1385_v44 = vsub.f32 %v492_v5, %v492_v5  ;;  %1051 = vmatpush.msk.msrb.mxu2 %vm1397_vm15, %v1118_v43  ;;  %v490_v59 = vsel %vm1440_vm6, 1.0, %v1117_v30  ;;  %vm408_vm8 = vmand %vm1418_vm3, %vm1318_vm1  ;;  %v353_v12 = vshra.s32 %v335_v54, 6  ;;  %v369_v19 = vand.u32 63, %v335_v54 }
  0x24   :  { %277 = vmatpush.msrb.mxu0 %v137_v53  ;;  %305 = vmatpush.msrb.mxu1 %v1163_v9  ;;  %vm1461_vm10 = vcmp.eq.s32.totalorder %v355_v48, %v1309_v15  ;;  %v370_v61 = vand.u32 63, %v336_v46  ;;  %v1467_v63 = vsub.f32 %v490_v59, %v490_v59  ;;  %vm440_vm11 = vmand %vm408_vm8, %vm1429_vm5  ;;  %vm1472_vm12 = vcmp.ge.s32.totalorder %v371_v47, %v1316_v31 }
  0x25   :  { %34 = vperm.xlu0 %1107, %v26_v29   ;;  %v555_v50 = vand.u32 4294901760, %v1385_v44  ;;  %1052 = vmatpush.msk.msrb.mxu2 %vm1440_vm6, %v1118_v43  ;;  %vm1485_vm13 = vmand %vm440_vm11, %vm1445_vm7  ;;  %vm1490_vm14 = vcmp.lt.s32.totalorder %v371_v47, %v1330_v34  ;;  %v2155_v9 = vmov 0  ;;  %v2157_v54 = vmov 0 }
  0x26   :  { %281 = vmatpush.msrb.mxu0 %v143_v57  ;;  %307 = vmatpush.msrb.mxu1 %v1165_v10  ;;  %v1424_v10 = vsub.f32 %v491_v51, %v491_v51  ;;  %v565_v13 = vand.u32 4294901760, %v1467_v63  ;;  %v489_v14 = vsel %vm1485_vm13, 1.0, %v1117_v30  ;;  %vm407_vm0 = vmand %vm1461_vm10, %vm1318_vm1  ;;  %vm1514_vm4 = vcmp.ge.s32.totalorder %v370_v61, %v1316_v31 }
  0x27   :  { %152 = vmatmul.f32.gmra.mxu1 %v1258_v49  ;;  %283 = vmatmul.f32.vlgmr.msrb.gmra.mxu0 %v1230_v35  ;;  %v556_v55 = vsub.f32 %v1385_v44, %v555_v50  ;;  %vm439_vm3 = vmand %vm407_vm0, %vm1472_vm12  ;;  %vm1533_vm7 = vcmp.lt.s32.totalorder %v370_v61, %v1330_v34  ;;  %vm1548_vm10 = vcmp.eq.s32.totalorder %v353_v12, %v1309_v15  ;;  %v367_v12 = vand.u32 63, %v333_v1 }
  0x28   :  { %309 = vmatpush.msrb.mxu1 %v1167_v11  ;;  %v354_v11 = vshra.s32 %v336_v46, 6  ;;  %v560_v58 = vand.u32 4294901760, %v1424_v10  ;;  %644 = vmatpush.msra.mxu0 %v1385_v44  ;;  %v566_v25 = vsub.f32 %v1467_v63, %v565_v13  ;;  %vm1528_vm5 = vmand %vm439_vm3, %vm1490_vm14  ;;  %vm1557_vm12 = vcmp.ge.s32.totalorder %v369_v19, %v1316_v31 }
  0x29   :  { %v557_v62 = vand.u32 4294901760, %v556_v55  ;;  %1053 = vmatpush.msk.msrb.mxu2 %vm1485_vm13, %v1118_v43  ;;  %v488_v33 = vsel %vm1528_vm5, 1.0, %v1117_v30  ;;  %vm1574_vm0 = vcmp.lt.s32.totalorder %v369_v19, %v1330_v34  ;;  %vm1591_vm3 = vcmp.eq.s32.totalorder %v352_v28, %v1309_v15 }
  0x2a   :  { %311 = vmatpush.msrb.mxu1 %v1189_v18  ;;  %v561_v18 = vsub.f32 %v1424_v10, %v560_v58  ;;  %646 = vmatpush.msra.mxu0 %v1424_v10  ;;  %vm1505_vm2 = vcmp.eq.s32.totalorder %v354_v11, %v1309_v15  ;;  %v567_v21 = vand.u32 4294901760, %v566_v25  ;;  %v366_v19 = vand.u32 63, %v332_v6 }
  0x2b   :  { %558 = vmatpush.msrb.mxu3 %v557_v62  ;;  %vm406_vm8 = vmand %vm1505_vm2, %vm1318_vm1  ;;  %1054 = vmatpush.msk.msrb.mxu2 %vm1528_vm5, %v1118_v43  ;;  %v330_v25 = vadd.s32 32, %v1297_v7  ;;  %v365_v28 = vand.u32 63, %v331_v16 }
  0x2c   :  { %313 = vmatpush.msrb.mxu1 %v1200_v22  ;;  %v562_v17 = vand.u32 4294901760, %v561_v18  ;;  %v1509_v22 = vsub.f32 %v489_v14, %v489_v14  ;;  %648 = vmatpush.msra.mxu0 %v1467_v63  ;;  %vm438_vm11 = vmand %vm406_vm8, %vm1514_vm4  ;;  %v351_v18 = vshra.s32 %v333_v1, 6  ;;  %v350_v14 = vshra.s32 %v332_v6, 6 }
  0x2d   :  { %vm1569_vm14 = vmand %vm438_vm11, %vm1533_vm7  ;;  %vm420_vm7 = vcmp.ge.s32.totalorder %v368_v3, %v1316_v31  ;;  %v364_v23 = vand.u32 63, %v330_v25  ;;  %v1769_v1 = vadd.s32 8, %v1297_v7 }
  0x2e   :  { %315 = vmatpush.msrb.mxu1 %v1210_v27  ;;  %v570_v27 = vand.u32 4294901760, %v1509_v22  ;;  %563 = vmatpush.msrb.mxu3 %v562_v17  ;;  %v487_v5 = vsel %vm1569_vm14, 1.0, %v1117_v30  ;;  %vm405_vm2 = vmand %vm1548_vm10, %vm1318_vm1  ;;  %vm453_vm10 = vcmp.lt.s32.totalorder %v368_v3, %v1330_v34  ;;  %v348_v3 = vshra.s32 %v330_v25, 6 }
  0x2f   :  { %287 = vmatmul.f32.gmra.mxu0 %v1258_v49  ;;  %317 = vmatmul.f32.vlgmr.msrb.gmra.mxu1 %v1230_v35  ;;  %v1552_v35 = vsub.f32 %v488_v33, %v488_v33  ;;  %v1598_v45 = vsub.f32 %v487_v5, %v487_v5  ;;  %vm437_vm4 = vmand %vm405_vm2, %vm1557_vm12  ;;  %vm386_vm2 = vcmp.eq.s32.totalorder %v351_v18, %v1309_v15  ;;  %v2181_v25 = vmov 0 }
  0x30   :  { %v571_v4 = vsub.f32 %v1509_v22, %v570_v27  ;;  %1066 = vmatpush.msk.msra.mxu1 %vm1356_vm9, %v1118_v43  ;;  %650 = vmatpush.msra.mxu0 %v1509_v22  ;;  %vm1612_vm8 = vmand %vm437_vm4, %vm1574_vm0  ;;  %vm419_vm4 = vcmp.ge.s32.totalorder %v367_v12, %v1316_v31 }
  0x31   :  { %568 = vmatpush.msrb.mxu3 %v567_v21  ;;  %v575_v39 = vand.u32 4294901760, %v1552_v35  ;;  %1055 = vmatpush.msk.msrb.mxu2 %vm1569_vm14, %v1118_v43  ;;  %v2156_v9 = vsel %vm1612_vm8, 4294967295, %v2155_v9  ;;  %v580_v48 = vand.u32 4294901760, %v1598_v45  ;;  %v486_v51 = vsel %vm1612_vm8, 1.0, %v1117_v30  ;;  %vm404_vm11 = vmand %vm1591_vm3, %vm1318_vm1 }
  0x32   :  { %v572_v41 = vand.u32 4294901760, %v571_v4  ;;  %1067 = vmatpush.msk.msra.mxu1 %vm1397_vm15, %v1118_v43  ;;  %652 = vmatpush.msra.mxu0 %v1552_v35  ;;  %v1628_v47 = vsub.f32 %v486_v51, %v486_v51  ;;  %vm436_vm12 = vmand %vm404_vm11, %vm420_vm7  ;;  %vm1684_vm11 = vcmp.eq.s32.totalorder %v350_v14, %v1309_v15  ;;  %v329_v4 = vadd.s32 24, %v1297_v7 }
  0x33   :  { %v576_v46 = vsub.f32 %v1552_v35, %v575_v39  ;;  %1056 = vmatpush.msk.msrb.mxu2 %vm1612_vm8, %v1118_v43  ;;  %v581_v53 = vsub.f32 %v1598_v45, %v580_v48  ;;  %vm1638_vm0 = vmand %vm436_vm12, %vm453_vm10  ;;  %vm452_vm10 = vcmp.lt.s32.totalorder %v367_v12, %v1330_v34  ;;  %v362_v14 = vand.u32 63, %v328_v40 }
  0x34   :  { %573 = vmatpush.msrb.mxu3 %v572_v41  ;;  %1068 = vmatpush.msk.msra.mxu1 %vm1440_vm6, %v1118_v43  ;;  %v2158_v54 = vsel %vm1638_vm0, 4294967295, %v2157_v54  ;;  %v585_v55 = vand.u32 4294901760, %v1628_v47  ;;  %v485_v57 = vsel %vm1638_vm0, 1.0, %v1117_v30  ;;  %vm403_vm3 = vmand %vm386_vm2, %vm1318_vm1  ;;  %vm418_vm2 = vcmp.ge.s32.totalorder %v366_v19, %v1316_v31 }
  0x35   :  { %v577_v52 = vand.u32 4294901760, %v576_v46  ;;  %654 = vmatpush.msra.mxu0 %v1598_v45  ;;  %1057 = vmatpush.msk.msrb.mxu2 %vm1638_vm0, %v1118_v43  ;;  %v1649_v11 = vsub.f32 %v485_v57, %v485_v57  ;;  %vm435_vm7 = vmand %vm403_vm3, %vm419_vm4  ;;  %vm451_vm4 = vcmp.lt.s32.totalorder %v366_v19, %v1330_v34 }
  0x36   :  { %1069 = vmatpush.msk.msra.mxu1 %vm1485_vm13, %v1118_v43  ;;  %v586_v59 = vsub.f32 %v1628_v47, %v585_v55  ;;  %vm1689_vm12 = vmand %vm435_vm7, %vm452_vm10  ;;  %vm417_vm10 = vcmp.ge.s32.totalorder %v365_v28, %v1316_v31 }
  0x37   :  { %321 = vmatmul.f32.gmra.mxu1 %v1258_v49  ;;  %578 = vmatpush.msrb.mxu3 %v577_v52  ;;  %v582_v49 = vand.u32 4294901760, %v581_v53  ;;  %v590_v60 = vand.u32 4294901760, %v1649_v11  ;;  %v2162_v20 = vsel %vm1689_vm12, 4294967295, %v2161_v20  ;;  %v484_v33 = vsel %vm1689_vm12, 1.0, %v1117_v30  ;;  %vm402_vm3 = vmand %vm1684_vm11, %vm1318_vm1 }
  0x38   :  { %656 = vmatpush.msra.mxu0 %v1628_v47  ;;  %1070 = vmatpush.msk.msra.mxu1 %vm1528_vm5, %v1118_v43  ;;  %v587_v61 = vand.u32 4294901760, %v586_v59  ;;  %v1713_v21 = vsub.f32 %v484_v33, %v484_v33  ;;  %vm434_vm7 = vmand %vm402_vm3, %vm418_vm2  ;;  %vm1736_vm3 = vcmp.eq.s32.totalorder %v348_v3, %v1309_v15  ;;  %v347_v52 = vshra.s32 %v329_v4, 6 }
  0x39   :  { %583 = vmatpush.msrb.mxu3 %v582_v49  ;;  %v591_v62 = vsub.f32 %v1649_v11, %v590_v60  ;;  %1058 = vmatpush.msk.msrb.mxu2 %vm1689_vm12, %v1118_v43  ;;  %vm1717_vm11 = vmand %vm434_vm7, %vm451_vm4  ;;  %vm1747_vm7 = vcmp.ge.s32.totalorder %v364_v23, %v1316_v31  ;;  %v363_v49 = vand.u32 63, %v329_v4  ;;  %v345_v33 = vshra.s32 %v1769_v1, 6 }
  0x3a   :  { %658 = vmatpush.msra.mxu0 %v1649_v11  ;;  %1071 = vmatpush.msk.msra.mxu1 %vm1569_vm14, %v1118_v43  ;;  %v2166_v38 = vsel %vm1717_vm11, 4294967295, %v2165_v38  ;;  %v595_v41 = vand.u32 4294901760, %v1713_v21  ;;  %v483_v46 = vsel %vm1717_vm11, 1.0, %v1117_v30  ;;  %v361_v4 = vand.u32 63, %v1769_v1 }
  0x3b   :  { %588 = vmatpush.msrb.mxu3 %v587_v61  ;;  %v592_v0 = vand.u32 4294901760, %v591_v62  ;;  %1059 = vmatpush.msk.msrb.mxu2 %vm1717_vm11, %v1118_v43  ;;  %v1744_v53 = vsub.f32 %v483_v46, %v483_v46  ;;  %v2173_v61 = vmov 0 }
  0x3c   :  { %1072 = vmatpush.msk.msra.mxu1 %vm1612_vm8, %v1118_v43  ;;  %vm1722_vm8 = vcmp.lt.s32.totalorder %v365_v28, %v1330_v34  ;;  %660 = vmatpush.msra.mxu0 %v1713_v21  ;;  %v596_v59 = vsub.f32 %v1713_v21, %v595_v41 }
  0x3d   :  { %593 = vmatpush.msrb.mxu3 %v592_v0  ;;  %v346_v0 = vshra.s32 %v328_v40, 6  ;;  %v600_v18 = vand.u32 4294901760, %v1744_v53 }
  0x3e   :  { %1073 = vmatpush.msk.msra.mxu1 %vm1638_vm0, %v1118_v43  ;;  %vm1703_vm0 = vcmp.eq.s32.totalorder %v349_v24, %v1309_v15  ;;  %662 = vmatpush.msra.mxu0 %v1744_v53  ;;  %v597_v16 = vand.u32 4294901760, %v596_v59 }
  0x3f   :  { %vm401_vm2 = vmand %vm1703_vm0, %vm1318_vm1  ;;  %v601_v24 = vsub.f32 %v1744_v53, %v600_v18 }
  0x40   :  { %1074 = vmatpush.msk.msra.mxu1 %vm1689_vm12, %v1118_v43  ;;  %vm433_vm4 = vmand %vm401_vm2, %vm417_vm10  ;;  %vm1764_vm10 = vcmp.lt.s32.totalorder %v364_v23, %v1330_v34  ;;  %vm1780_vm2 = vcmp.eq.s32.totalorder %v347_v52, %v1309_v15  ;;  %598 = vmatpush.msrb.mxu3 %v597_v16  ;;  %v2189_v52 = vmov 0 }
  0x41   :  { %vm1759_vm0 = vmand %vm433_vm4, %vm1722_vm8  ;;  %v602_v5 = vand.u32 4294901760, %v601_v24 }
  0x42   :  { %1075 = vmatpush.msk.msra.mxu1 %vm1717_vm11, %v1118_v43  ;;  %v2174_v61 = vsel %vm1759_vm0, 4294967295, %v2173_v61  ;;  %v482_v6 = vsel %vm1759_vm0, 1.0, %v1117_v30  ;;  %vm400_vm8 = vmand %vm1736_vm3, %vm1318_vm1  ;;  %1060 = vmatpush.msk.msrb.mxu2 %vm1759_vm0, %v1118_v43  ;;  %vm1793_vm3 = vcmp.ge.s32.totalorder %v363_v49, %v1316_v31 }
  0x43   :  { %v1788_v19 = vsub.f32 %v482_v6, %v482_v6  ;;  %vm432_vm4 = vmand %vm400_vm8, %vm1747_vm7  ;;  %vm1810_vm7 = vcmp.lt.s32.totalorder %v363_v49, %v1330_v34  ;;  %vm1824_vm8 = vcmp.eq.s32.totalorder %v346_v0, %v1309_v15  ;;  %v344_v49 = vshra.s32 %v1297_v7, 6  ;;  %603 = vmatpush.msrb.mxu3 %v602_v5 }
  0x44   :  { %1076 = vmatpush.msk.msra.mxu1 %vm1759_vm0, %v1118_v43  ;;  %vm1805_vm11 = vmand %vm432_vm4, %vm1764_vm10  ;;  %vm1837_vm0 = vcmp.ge.s32.totalorder %v362_v14, %v1316_v31  ;;  %v360_v6 = vand.u32 63, %v1297_v7 }
  0x45   :  { %v2182_v25 = vsel %vm1805_vm11, 4294967295, %v2181_v25  ;;  %v605_v36 = vand.u32 4294901760, %v1788_v19  ;;  %v481_v3 = vsel %vm1805_vm11, 1.0, %v1117_v30  ;;  %vm399_vm10 = vmand %vm1780_vm2, %vm1318_vm1  ;;  %1061 = vmatpush.msk.msrb.mxu2 %vm1805_vm11, %v1118_v43  ;;  %664 = vmatpush.msra.mxu0 %v1788_v19 }
  0x46   :  { %v1832_v40 = vsub.f32 %v481_v3, %v481_v3  ;;  %vm431_vm4 = vmand %vm399_vm10, %vm1793_vm3  ;;  %1077 = vmatpush.msk.msra.mxu1 %vm1805_vm11, %v1118_v43  ;;  %vm1855_vm3 = vcmp.lt.s32.totalorder %v362_v14, %v1330_v34  ;;  %vm1869_vm10 = vcmp.eq.s32.totalorder %v345_v33, %v1309_v15  ;;  %vm413_vm11 = vcmp.ge.s32.totalorder %v361_v4, %v1316_v31 }
  0x47   :  { %v606_v51 = vsub.f32 %v1788_v19, %v605_v36  ;;  %vm1850_vm2 = vmand %vm431_vm4, %vm1810_vm7  ;;  %vm445_vm12 = vcmp.lt.s32.totalorder %v360_v6, %v1330_v34  ;;  %v493_v33 = vshra.s32 %v1299_v8, 6 }
  0x48   :  { %v2190_v52 = vsel %vm1850_vm2, 4294967295, %v2189_v52  ;;  %v610_v59 = vand.u32 4294901760, %v1832_v40  ;;  %v480_v62 = vsel %vm1850_vm2, 1.0, %v1117_v30  ;;  %vm398_vm7 = vmand %vm1824_vm8, %vm1318_vm1  ;;  %1062 = vmatpush.msk.msrb.mxu2 %vm1850_vm2, %v1118_v43  ;;  %666 = vmatpush.msra.mxu0 %v1832_v40 }
  0x49   :  { %v607_v12 = vand.u32 4294901760, %v606_v51  ;;  %v1877_v14 = vsub.f32 %v480_v62, %v480_v62  ;;  %vm430_vm4 = vmand %vm398_vm7, %vm1837_vm0  ;;  %1078 = vmatpush.msk.msra.mxu1 %vm1850_vm2, %v1118_v43  ;;  %vm446_vm0 = vcmp.lt.s32.totalorder %v361_v4, %v1330_v34  ;;  %vm1905_vm2 = vcmp.eq.s32.totalorder %v344_v49, %v1309_v15 }
  0x4a   :  { %v611_v16 = vsub.f32 %v1832_v40, %v610_v59  ;;  %vm1891_vm8 = vmand %vm430_vm4, %vm1855_vm3  ;;  %vm412_vm4 = vcmp.ge.s32.totalorder %v360_v6, %v1316_v31  ;;  %v497_v4 = vand.u32 7, %v1297_v7 }
  0x4b   :  { %608 = vmatpush.msrb.mxu3 %v607_v12  ;;  %v615_v24 = vand.u32 4294901760, %v1877_v14  ;;  %v479_v28 = vsel %vm1891_vm8, 1.0, %v1117_v30  ;;  %vm397_vm7 = vmand %vm1869_vm10, %vm1318_vm1  ;;  %1063 = vmatpush.msk.msrb.mxu2 %vm1891_vm8, %v1118_v43 }
  0x4c   :  { %v612_v3 = vand.u32 4294901760, %v611_v16  ;;  %v1912_v23 = vsub.f32 %v479_v28, %v479_v28  ;;  %vm429_vm3 = vmand %vm397_vm7, %vm413_vm11  ;;  %668 = vmatpush.msra.mxu0 %v1877_v14  ;;  %1079 = vmatpush.msk.msra.mxu1 %vm1891_vm8, %v1118_v43 }
  0x4d   :  { %v616_v15 = vsub.f32 %v1877_v14, %v615_v24  ;;  %vm1922_vm10 = vmand %vm429_vm3, %vm446_vm0 }
  0x4e   :  { %613 = vmatpush.msrb.mxu3 %v612_v3  ;;  %v620_v5 = vand.u32 4294901760, %v1912_v23  ;;  %v478_v31 = vsel %vm1922_vm10, 1.0, %v1117_v30  ;;  %vm396_vm11 = vmand %vm1905_vm2, %vm1318_vm1  ;;  %1064 = vmatpush.msk.msrb.mxu2 %vm1922_vm10, %v1118_v43  ;;  %vm2203_vm1 = vnez %v2156_v9  ;;  %v495_v3 = vshra.s32 %v1297_v7, 3 }
  0x4f   :  { %v617_v46 = vand.u32 4294901760, %v616_v15  ;;  %v624_v51 = vsub.f32 %v478_v31, %v478_v31  ;;  %vm428_vm0 = vmand %vm396_vm11, %vm412_vm4  ;;  %670 = vmatpush.msra.mxu0 %v1912_v23  ;;  %1080 = vmatpush.msk.msra.mxu1 %vm1922_vm10, %v1118_v43  ;;  %v494_v15 = vand.u32 63, %v1299_v8 }
  0x50   :  { %v621_v34 = vsub.f32 %v1912_v23, %v620_v5  ;;  %vm1943_vm7 = vmand %vm428_vm0, %vm445_vm12  ;;  %v496_v23 = vshra.s32 %v1769_v1, 3  ;;  %vm2044_vm12 = vcmp.eq.s32.totalorder %v493_v33, %v495_v3 }
  0x51   :  { %618 = vmatpush.msrb.mxu3 %v617_v46  ;;  %v625_v57 = vand.u32 4294901760, %v624_v51  ;;  %v477_v49 = vsel %vm1943_vm7, 1.0, %v1117_v30  ;;  %1065 = vmatpush.msk.msrb.mxu2 %vm1943_vm7, %v1118_v43 }
  0x52   :  { %v622_v62 = vand.u32 4294901760, %v621_v34  ;;  %v629_v0 = vsub.f32 %v477_v49, %v477_v49  ;;  %672 = vmatpush.msra.mxu0 %v624_v51  ;;  %1081 = vmatpush.msk.msra.mxu1 %vm1943_vm7, %v1118_v43  ;;  %vm502_vm2 = vcmp.eq.s32.totalorder %v493_v33, %v496_v23  ;;  %v499_v34 = vmul.u32 7, %v497_v4 }
  0x53   :  { %717 = vmatpush.msra.mxu2 %v555_v50  ;;  %v626_v6 = vsub.f32 %v624_v51, %v625_v57 }
  0x54   :  { %623 = vmatpush.msrb.mxu3 %v622_v62  ;;  %v630_v12 = vand.u32 4294901760, %v629_v0  ;;  %674 = vmatpush.msra.mxu0 %v629_v0  ;;  %vm507_vm0 = vcmp.ge.s32.totalorder %v494_v15, %v499_v34  ;;  %v511_v7 = vadd.s32 7, %v499_v34 }
  0x55   :  { %720 = vmatpush.msra.mxu2 %v560_v58  ;;  %v627_v16 = vand.u32 4294901760, %v626_v6 }
  0x56   :  { %v631_v28 = vsub.f32 %v629_v0, %v630_v12 }
  0x57   :  { %723 = vmatpush.msra.mxu2 %v565_v13  ;;  %628 = vmatpush.msrb.mxu3 %v627_v16 }
  0x58   :  { %v632_v44 = vand.u32 4294901760, %v631_v28 }
  0x59   :  { %726 = vmatpush.msra.mxu2 %v570_v27 }
  0x5a   :  { %633 = vmatpush.msrb.mxu3 %v632_v44 }
  0x5b   :  { %729 = vmatpush.msra.mxu2 %v575_v39 }
  0x5c   :  { %1082 = vmatpush.msk.msra.mxu3 %vm1356_vm9, %v1118_v43  ;;  %vm2204_vm9 = vnez %v2158_v54 }
  0x5d   :  { %732 = vmatpush.msra.mxu2 %v580_v48 }
  0x5e   :  { %1083 = vmatpush.msk.msra.mxu3 %vm1397_vm15, %v1118_v43  ;;  %vm2205_vm15 = vnez %v2162_v20 }
  0x5f   :  { %735 = vmatpush.msra.mxu2 %v585_v55 }
  0x60   :  { %1084 = vmatpush.msk.msra.mxu3 %vm1440_vm6, %v1118_v43  ;;  %vm2206_vm6 = vnez %v2166_v38 }
  0x61   :  { %738 = vmatpush.msra.mxu2 %v590_v60 }
  0x62   :  { %1085 = vmatpush.msk.msra.mxu3 %vm1485_vm13, %v1118_v43  ;;  %vm2207_vm13 = vnez %v2174_v61 }
  0x63   :  { %741 = vmatpush.msra.mxu2 %v595_v41 }
  0x64   :  { %1086 = vmatpush.msk.msra.mxu3 %vm1528_vm5, %v1118_v43  ;;  %vm2208_vm5 = vnez %v2182_v25 }
  0x65   :  { %744 = vmatpush.msra.mxu2 %v600_v18 }
  0x66   :  { %1087 = vmatpush.msk.msra.mxu3 %vm1569_vm14, %v1118_v43  ;;  %vm2209_vm14 = vnez %v2190_v52 }
  0x67   :  { %747 = vmatpush.msra.mxu2 %v605_v36 }
  0x68   :  { %1088 = vmatpush.msk.msra.mxu3 %vm2203_vm1, %v1118_v43 }
  0x69   :  { %750 = vmatpush.msra.mxu2 %v610_v59 }
  0x6a   :  { %1089 = vmatpush.msk.msra.mxu3 %vm2204_vm9, %v1118_v43 }
  0x6b   :  { %753 = vmatpush.msra.mxu2 %v615_v24 }
  0x6c   :  { %1090 = vmatpush.msk.msra.mxu3 %vm2205_vm15, %v1118_v43  ;;  %vm513_vm15 = vcmp.lt.s32.totalorder %v494_v15, %v511_v7 }
  0x6d   :  { %756 = vmatpush.msra.mxu2 %v620_v5  ;;  %v498_v5 = vand.u32 7, %v1769_v1 }
  0x6e   :  { %1091 = vmatpush.msk.msra.mxu3 %vm2206_vm6, %v1118_v43 }
  0x6f   :  { %759 = vmatpush.msra.mxu2 %v625_v57  ;;  %v500_v51 = vmul.u32 7, %v498_v5  ;;  %vm504_vm3 = vcmp.lt.s32.totalorder %v498_v5, 7 }
  0x70   :  { %1092 = vmatpush.msk.msra.mxu3 %vm2207_vm13, %v1118_v43 }
  0x71   :  { %762 = vmatpush.msra.mxu2 %v630_v12  ;;  %vm508_vm11 = vcmp.ge.s32.totalorder %v494_v15, %v500_v51  ;;  %v512_v8 = vadd.s32 7, %v500_v51 }
  0x72   :  { %1093 = vmatpush.msk.msra.mxu3 %vm2208_vm5, %v1118_v43 }
  0x73   :  { %vm514_vm1 = vcmp.lt.s32.totalorder %v494_v15, %v512_v8 }
  0x74   :  { %1094 = vmatpush.msk.msra.mxu3 %vm2209_vm14, %v1118_v43 }
  0x76   :  { %1095 = vmatpush.msk.msra.mxu3 %vm1891_vm8, %v1118_v43  ;;  %vm503_vm8 = vcmp.lt.s32.totalorder %v497_v4, 7 }
  0x77   :  { %vm505_vm4 = vmand %vm2044_vm12, %vm503_vm8 }
  0x78   :  { %1096 = vmatpush.msk.msra.mxu3 %vm1922_vm10, %v1118_v43  ;;  %vm506_vm10 = vmand %vm502_vm2, %vm504_vm3 }
  0x79   :  { %vm509_vm9 = vmand %vm505_vm4, %vm507_vm0 }
  0x7a   :  { %1097 = vmatpush.msk.msra.mxu3 %vm1943_vm7, %v1118_v43  ;;  %vm510_vm7 = vmand %vm506_vm10, %vm508_vm11  ;;  %vm857_vm11 = vcmask 130048  }
  0x7b   :  { %vm2050_vm6 = vmand %vm510_vm7, %vm514_vm1 }
  0x7c   :  { %v518_v57 = vsel %vm2050_vm6, 1.0, %v1117_v30  ;;  %1098 = vmatpush.msk.msrb.mxu0 %vm2050_vm6, %v1118_v43  ;;  %vm2060_vm13 = vmand %vm509_vm9, %vm513_vm15 }
  0x7d   :  { %v911_v0 = vsub.f32 %v518_v57, %v518_v57  ;;  %v517_v6 = vsel %vm2060_vm13, 1.0, %v1117_v30 }
  0x7e   :  { %v916_v28 = vsub.f32 %v517_v6, %v517_v6  ;;  %1099 = vmatpush.msk.msrb.mxu0 %vm2060_vm13, %v1118_v43 }
  0x7f   :  { %v912_v44 = vand.u32 4294901760, %v911_v0 }
  0x8f   :  { %v30_v42 = vpop.permute.xlu0 %29 }
  0x92   :  { %v75_v37 = vpop.f32.mrf.mxu0 }
  0x93   :  { %v76_v56 = vadd.f32 %v75_v37, %v30_v42  ;;  %v917_v37 = vand.u32 4294901760, %v916_v28 }
  0x95   :  { %v918_v30 = vsub.f32 %v916_v28, %v917_v37 }
  0x97   :  { %v35_v2 = vpop.permute.xlu0 %34 }
  0x9a   :  { %v83_v50 = vpop.f32.mrf.mxu0 }
  0x9b   :  { %v84_v27 = vadd.f32 %v83_v50, %v35_v2  ;;  %v913_v50 = vsub.f32 %v911_v0, %v912_v44 }
  0x9c   :  { %v149_v10 = vpop.f32.mrf.mxu1  ;;  %v193_v58 = vpop.f32.mrf.mxu2 }
  0x9d   :  { %v150_v63 = vadd.f32 %v149_v10, %v76_v56  ;;  %v230_v13 = vpop.f32.mrf.mxu3  ;;  %v914_v56 = vand.u32 4294901760, %v913_v50 }
  0x9f   :  { %v194_v26 = vadd.f32 %v193_v58, %v150_v63  ;;  %v919_v58 = vand.u32 4294901760, %v918_v30  ;;  %915 = vmatpush.msrb.mxu1 %v914_v56 }
  0xa1   :  { %v231_v29 = vadd.f32 %v230_v13, %v194_v26  ;;  %920 = vmatpush.msrb.mxu1 %v919_v58 }
  0xa4   :  { %v153_v22 = vpop.f32.mrf.mxu1  ;;  %v284_v35 = vpop.f32.mrf.mxu0 }
  0xa5   :  { %v154_v39 = vadd.f32 %v153_v22, %v84_v27  ;;  %v198_v45 = vpop.f32.mrf.mxu2  ;;  %v285_v9 = vadd.f32 %v284_v35, %v231_v29  ;;  %v236_v55 = vpop.f32.mrf.mxu3 }
  0xa7   :  { %v199_v47 = vadd.f32 %v198_v45, %v154_v39 }
  0xa9   :  { %v237_v20 = vadd.f32 %v236_v55, %v199_v47 }
  0xac   :  { %v318_v48 = vpop.f32.mrf.mxu1  ;;  %v288_v60 = vpop.f32.mrf.mxu0 }
  0xad   :  { %v2030_v54 = vadd.f32 %v318_v48, %v285_v9  ;;  %v289_v38 = vadd.f32 %v288_v60, %v237_v20 }
  0xaf   :  { %v519_v11 = vmul.f32 %v2030_v54, %v2030_v54 }
  0xb1   :  { %v537_v21 = vand.u32 4294901760, %v519_v11 }
  0xb3   :  { %v538_v41 = vsub.f32 %v519_v11, %v537_v21  ;;  %635 = vmatmul.f32.vlgmr.msrb.gmra.mxu3 %v537_v21 }
  0xb4   :  { %v322_v53 = vpop.f32.mrf.mxu1  ;;  %1100 = vmatpush.msk.msrb.mxu3 %vm2050_vm6, %v1118_v43 }
  0xb5   :  { %v2034_v61 = vadd.f32 %v322_v53, %v289_v38  ;;  %677 = vmatmul.f32.vlgmr.msra.gmra.mxu0 %v538_v41  ;;  %v539_v18 = vand.u32 4294901760, %v538_v41 }
  0xb6   :  { %1101 = vmatpush.msk.msrb.mxu3 %vm2060_vm13, %v1118_v43  ;;  %1004 = vmatpush.msra.mxu0 %v912_v44 }
  0xb7   :  { %v520_v19 = vmul.f32 %v2034_v61, %v2034_v61  ;;  %705 = vmatmul.f32.vlgmr.msra.gmra.mxu1 %v539_v18  ;;  %v540_v25 = vsub.f32 %v538_v41, %v539_v18 }
  0xb8   :  { %1007 = vmatpush.msra.mxu0 %v917_v37  ;;  %1102 = vmatpush.msk.msra.mxu1 %vm2050_vm6, %v1118_v43 }
  0xb9   :  { %v545_v36 = vand.u32 4294901760, %v520_v19  ;;  %v541_v40 = vand.u32 4294901760, %v540_v25 }
  0xba   :  { %1103 = vmatpush.msk.msra.mxu1 %vm2060_vm13, %v1118_v43 }
  0xbb   :  { %542 = vmatmul.f32.vlgmr.msrb.gmra.mxu2 %v541_v40  ;;  %639 = vmatmul.f32.gmra.mxu3 %v545_v36  ;;  %v546_v52 = vsub.f32 %v520_v19, %v545_v36 }
  0xbc   :  { %945 = vmatpush.msrb.mxu2 %v911_v0 }
  0xbd   :  { %682 = vmatmul.f32.gmra.mxu0 %v546_v52  ;;  %v547_v59 = vand.u32 4294901760, %v546_v52 }
  0xbe   :  { %947 = vmatpush.msrb.mxu2 %v916_v28 }
  0xbf   :  { %711 = vmatmul.f32.gmra.mxu1 %v547_v59  ;;  %v548_v14 = vsub.f32 %v546_v52, %v547_v59 }
  0xc1   :  { %v549_v17 = vand.u32 4294901760, %v548_v14 }
  0xc3   :  { %550 = vmatmul.f32.gmra.mxu2 %v549_v17  ;;  %789 = vmatmul.f32.vlgmr.msra.gmra.mxu3 %v537_v21 }
  0xcb   :  { %764 = vmatmul.f32.vlgmr.msra.gmra.mxu2 %v537_v21  ;;  %793 = vmatmul.f32.gmra.mxu3 %v545_v36 }
  0xd3   :  { %768 = vmatmul.f32.gmra.mxu2 %v545_v36 }
 0x132   :  { %v678_v12 = vpop.f32.mrf.mxu0 }
 0x134   :  { %v706_v10 = vpop.f32.mrf.mxu1 }
 0x136   :  { %v636_v24 = vpop.f32.mrf.mxu3 }
 0x13a   :  { %v683_v27 = vpop.f32.mrf.mxu0 }
 0x13c   :  { %v712_v39 = vpop.f32.mrf.mxu1 }
 0x13e   :  { %v543_v46 = vpop.f32.mrf.mxu2  ;;  %v640_v32 = vpop.f32.mrf.mxu3 }
 0x13f   :  { %v637_v62 = vadd.f32 %v636_v24, %v543_v46 }
 0x141   :  { %v679_v42 = vadd.f32 %v678_v12, %v637_v62 }
 0x143   :  { %v707_v2 = vadd.f32 %v706_v10, %v679_v42 }
 0x146   :  { %v551_v16 = vpop.f32.mrf.mxu2  ;;  %v790_v13 = vpop.f32.mrf.mxu3 }
 0x147   :  { %v641_v63 = vadd.f32 %v640_v32, %v551_v16 }
 0x149   :  { %v684_v35 = vadd.f32 %v683_v27, %v641_v63 }
 0x14b   :  { %v713_v45 = vadd.f32 %v712_v39, %v684_v35 }
 0x14e   :  { %v765_v22 = vpop.f32.mrf.mxu2  ;;  %v794_v47 = vpop.f32.mrf.mxu3 }
 0x14f   :  { %v766_v26 = vadd.f32 %v765_v22, %v707_v2 }
 0x151   :  { %v791_v29 = vadd.f32 %v790_v13, %v766_v26 }
 0x153   :  { %1108 = vrsqrt.f32 %v791_v29  ;;  %vm804_vm5 = vcmp.eq.f32.partialorder %v791_v29, inf  ;;  %v807_v43 = vand.u32 2147483648, %v791_v29  ;;  %vm806_vm14 = vcmp.eq.f32.partialorder %v791_v29, 0.0 }
 0x154   :  { %v823_v14 = vadd.f32 1.0, %v791_v29 }
 0x156   :  { %v769_v9 = vpop.f32.mrf.mxu2 }
 0x157   :  { %v770_v48 = vadd.f32 %v769_v9, %v713_v45 }
 0x159   :  { %v1109_v55 = vpop.eup %1108  ;;  %v795_v11 = vadd.f32 %v794_v47, %v770_v48 }
 0x15a   :  { %v798_v60 = vmul.f32 %v1109_v55, %v791_v29 }
 0x15b   :  { %1110 = vrsqrt.f32 %v795_v11  ;;  %vm816_vm12 = vcmp.eq.f32.partialorder %v795_v11, inf  ;;  %v819_v23 = vand.u32 2147483648, %v795_v11  ;;  %vm818_vm2 = vcmp.eq.f32.partialorder %v795_v11, 0.0 }
 0x15c   :  { %v799_v20 = vmul.f32 %v1109_v55, %v798_v60  ;;  %v824_v31 = vadd.f32 1.0, %v795_v11 }
 0x15e   :  { %v800_v21 = vmul.f32 0.5, %v799_v20 }
 0x160   :  { %v801_v38 = vsub.f32 1.5, %v800_v21 }
 0x161   :  { %v1111_v41 = vpop.eup %1110 }
 0x162   :  { %v802_v53 = vmul.f32 %v1109_v55, %v801_v38  ;;  %v810_v18 = vmul.f32 %v1111_v41, %v795_v11 }
 0x164   :  { %v803_v19 = vmul.f32 %v802_v53, %v791_v29  ;;  %v811_v25 = vmul.f32 %v1111_v41, %v810_v18 }
 0x166   :  { %v805_v36 = vsel %vm804_vm5, %v791_v29, %v803_v19  ;;  %v812_v40 = vmul.f32 0.5, %v811_v25 }
 0x167   :  { %v808_v52 = vsel %vm806_vm14, %v807_v43, %v805_v36 }
 0x168   :  { %v821_v59 = vadd.f32 1.0, %v808_v52  ;;  %v813_v17 = vsub.f32 1.5, %v812_v40 }
 0x16a   :  { %v825_v24 = vmul.f32 %v823_v14, %v821_v59  ;;  %v814_v33 = vmul.f32 %v1111_v41, %v813_v17 }
 0x16c   :  { %1112 = vrcp.f32 %v825_v24  ;;  %v815_v3 = vmul.f32 %v814_v33, %v795_v11  ;;  %v838_v7 = vand.u32 2147483648, %v825_v24  ;;  %v836_v32 = vand.u32 2147483647, %v825_v24 }
 0x16d   :  { %vm832_vm3 = vweird.f32 %v825_v24 }
 0x16e   :  { %v817_v15 = vsel %vm816_vm12, %v795_v11, %v815_v3  ;;  %v839_v49 = vor.u32 1.1754944e-38, %v838_v7  ;;  %vm837_vm10 = vcmp.eq.f32.partialorder %v836_v32, 8.507059e+37 }
 0x16f   :  { %v820_v4 = vsel %vm818_vm2, %v819_v23, %v817_v15 }
 0x170   :  { %v822_v5 = vadd.f32 1.0, %v820_v4 }
 0x172   :  { %v1113_v46 = vpop.eup %1112  ;;  %v826_v34 = vmul.f32 %v824_v31, %v822_v5 }
 0x173   :  { %v828_v51 = vmul.f32 %v1113_v46, %v825_v24  ;;  %vm833_vm8 = vweird.f32 %v1113_v46 }
 0x174   :  { %1114 = vrcp.f32 %v826_v34  ;;  %vm834_vm4 = vmor %vm832_vm3, %vm833_vm8  ;;  %v853_v37 = vand.u32 2147483648, %v826_v34  ;;  %v851_v10 = vand.u32 2147483647, %v826_v34  ;;  %vm847_vm7 = vweird.f32 %v826_v34 }
 0x175   :  { %v829_v8 = vsub.f32 1.0, %v828_v51 }
 0x176   :  { %v854_v58 = vor.u32 1.1754944e-38, %v853_v37  ;;  %vm852_vm9 = vcmp.eq.f32.partialorder %v851_v10, 8.507059e+37 }
 0x177   :  { %v830_v1 = vmul.f32 %v1113_v46, %v829_v8 }
 0x179   :  { %v831_v57 = vadd.f32 %v1113_v46, %v830_v1 }
 0x17a   :  { %v1115_v62 = vpop.eup %1114 }
 0x17b   :  { %v835_v0 = vsel %vm834_vm4, %v1113_v46, %v831_v57  ;;  %v843_v12 = vmul.f32 %v1115_v62, %v826_v34  ;;  %vm848_vm0 = vweird.f32 %v1115_v62 }
 0x17c   :  { %v840_v6 = vsel %vm837_vm10, %v839_v49, %v835_v0  ;;  %vm849_vm1 = vmor %vm847_vm7, %vm848_vm0 }
 0x17d   :  { %v841_v16 = vmul.f32 %v840_v6, %v808_v52  ;;  %v844_v28 = vsub.f32 1.0, %v843_v12 }
 0x17f   :  { %v859_v44 = vsel %vm857_vm11, %v841_v16, 0  ;;  %v845_v50 = vmul.f32 %v1115_v62, %v844_v28 }
 0x180   :  { %v880_v42 = vand.u32 4294901760, %v859_v44 }
 0x181   :  { %v846_v56 = vadd.f32 %v1115_v62, %v845_v50 }
 0x182   :  { %922 = vmatmul.f32.vlgmr.msrb.gmra.mxu1 %v880_v42  ;;  %v881_v30 = vsub.f32 %v859_v44, %v880_v42 }
 0x183   :  { %v850_v2 = vsel %vm849_vm1, %v1115_v62, %v846_v56 }
 0x184   :  { %950 = vmatmul.f32.vlgmr.msrb.gmra.mxu2 %v881_v30  ;;  %v882_v63 = vand.u32 4294901760, %v881_v30  ;;  %v855_v13 = vsel %vm852_vm9, %v854_v58, %v850_v2 }
 0x185   :  { %v856_v26 = vmul.f32 %v855_v13, %v820_v4 }
 0x186   :  { %978 = vmatmul.f32.vlgmr.msrb.gmra.mxu3 %v882_v63  ;;  %v883_v22 = vsub.f32 %v881_v30, %v882_v63 }
 0x187   :  { %v862_v35 = vsel %vm857_vm11, %v856_v26, 0 }
 0x188   :  { %v884_v27 = vand.u32 4294901760, %v883_v22  ;;  %v888_v29 = vand.u32 4294901760, %v862_v35 }
 0x18a   :  { %885 = vmatmul.f32.vlgmr.msrb.gmra.mxu0 %v884_v27  ;;  %926 = vmatmul.f32.gmra.mxu1 %v888_v29  ;;  %v889_v39 = vsub.f32 %v862_v35, %v888_v29 }
 0x18c   :  { %955 = vmatmul.f32.gmra.mxu2 %v889_v39  ;;  %v890_v45 = vand.u32 4294901760, %v889_v39 }
 0x18e   :  { %984 = vmatmul.f32.gmra.mxu3 %v890_v45  ;;  %v891_v9 = vsub.f32 %v889_v39, %v890_v45 }
 0x190   :  { %v892_v48 = vand.u32 4294901760, %v891_v9 }
 0x192   :  { %893 = vmatmul.f32.gmra.mxu0 %v892_v48  ;;  %1034 = vmatmul.f32.vlgmr.msra.gmra.mxu1 %v880_v42 }
 0x19a   :  { %1009 = vmatmul.f32.vlgmr.msra.gmra.mxu0 %v880_v42  ;;  %1038 = vmatmul.f32.gmra.mxu1 %v888_v29 }
 0x1a2   :  { %1013 = vmatmul.f32.gmra.mxu0 %v888_v29 }
 0x1ff   :  { %v923_v47 = vpop.f32.mrf.mxu1 }
 0x207   :  { %v886_v55 = vpop.f32.mrf.mxu0  ;;  %v927_v11 = vpop.f32.mrf.mxu1 }
 0x208   :  { %v924_v60 = vadd.f32 %v923_v47, %v886_v55  ;;  %v951_v20 = vpop.f32.mrf.mxu2 }
 0x209   :  { %v979_v41 = vpop.f32.mrf.mxu3 }
 0x20a   :  { %v952_v38 = vadd.f32 %v951_v20, %v924_v60 }
 0x20c   :  { %v980_v53 = vadd.f32 %v979_v41, %v952_v38 }
 0x20f   :  { %v894_v21 = vpop.f32.mrf.mxu0  ;;  %v1035_v19 = vpop.f32.mrf.mxu1 }
 0x210   :  { %v928_v18 = vadd.f32 %v927_v11, %v894_v21  ;;  %v956_v36 = vpop.f32.mrf.mxu2 }
 0x211   :  { %v985_v14 = vpop.f32.mrf.mxu3 }
 0x212   :  { %v957_v40 = vadd.f32 %v956_v36, %v928_v18 }
 0x214   :  { %v986_v17 = vadd.f32 %v985_v14, %v957_v40 }
 0x217   :  { %v1010_v25 = vpop.f32.mrf.mxu0  ;;  %v1039_v3 = vpop.f32.mrf.mxu1 }
 0x218   :  { %v1011_v43 = vadd.f32 %v1010_v25, %v980_v53 }
 0x21a   :  { %v1036_v52 = vadd.f32 %v1035_v19, %v1011_v43 }
 0x21c   :  { %v1042_v59 = vmul.f32 %v1036_v52, %v2030_v54 }
 0x21e   :  { %1044 = vst [vmem:[%s2095_s3] sm:$0xff] %v1042_v59 }
 0x21f   :  { %v1014_v24 = vpop.f32.mrf.mxu0 }
 0x220   :  { %v1015_v33 = vadd.f32 %v1014_v24, %v986_v17 }
 0x222   :  { %v1040_v23 = vadd.f32 %v1039_v3, %v1015_v33 }
 0x224   :  { %v1043_v15 = vmul.f32 %v1040_v23, %v2034_v61 }
 0x226   :  { %1045 = vst [vmem:[%s2095_s3 + $0x8] sm:$0xff] %v1043_v15 }

</bundles_post_ra>
